<compile_context>
chip_gen: v7x
topology: tpu7x:2x2x1
jax: 0.10.0
libtpu: 0.0.40
codegen_flags: <defaults>
</compile_context>

<pallas_src>
import functools
from itertools import combinations

import numpy as np
import jax
import jax.numpy as jnp
from jax import lax
from jax.experimental import pallas as pl
from jax.experimental.pallas import tpu as pltpu


def all_triplet_selector(labels_np):
    """Deterministic AllTripletSelector.get_triplets equivalent (host-side)."""
    # TODO(synk): hard-negative mining selectors would need the pairwise
    # distance matrix; here we reproduce the "all triplets" selector.
    triplets = []
    for label in sorted(set(labels_np.tolist())):
        label_mask = labels_np == label
        label_indices = np.where(label_mask)[0]
        if len(label_indices) < 2:
            continue
        negative_indices = np.where(np.logical_not(label_mask))[0]
        anchor_positives = list(combinations(label_indices, 2))
        triplets += [[ap[0], ap[1], neg]
                     for ap in anchor_positives for neg in negative_indices]
    return np.asarray(triplets, dtype=np.int32)


def _round_up(x, m):
    return ((x + m - 1) // m) * m


def _triplet_tile_kernel(idx_ref, embT_ref, out_ref, *, margin, num_triplets):
    """One grid step = one tile of `tile` triplets.

    idx_ref : (3, tile) int32        anchor / positive / negative row ids (lanes).
    embT_ref: (2*D_pad, N_pad) bf16  resident transposed table, hi stacked over lo.
    out_ref : (1, 8, tile==128? no: 128) f32  per-tile partial loss sum (broadcast).
    """
    i = pl.program_id(0)

    embT = embT_ref[...]                        # (2*D_pad, N_pad) bf16
    idx = idx_ref[...]                          # (3, tile) int32
    d2, n_pad = embT.shape
    d_pad = d2 // 2
    tile = idx.shape[1]

    # Tiny loop-invariant (N_pad, 1) iota; compare broadcasts against (1, tile).
    row_ids = lax.broadcasted_iota(jnp.int32, (n_pad, 1), 0)
    oh_a = (row_ids == idx[0:1, :]).astype(jnp.float32)        # (N_pad, tile)
    oh_p = (row_ids == idx[1:2, :]).astype(jnp.float32)
    oh_n = (row_ids == idx[2:3, :]).astype(jnp.float32)

    # Fused signed selectors:  dp - dn = (n - p) . (2a - p - n).
    # Values are in {-2,...,2} -> exact in bf16.
    s1 = (oh_n - oh_p).astype(jnp.bfloat16)                    # gathers n - p
    s2 = (2.0 * oh_a - oh_p - oh_n).astype(jnp.bfloat16)       # gathers 2a - p - n
    sel = jnp.concatenate([s1, s2], axis=1)                    # (N_pad, 2*tile)

    # Single bf16 MXU pass; hi/lo split recovers ~f32 gather precision.
    res = jnp.dot(embT, sel, preferred_element_type=jnp.float32)  # (2*D_pad, 2*tile)
    g1 = res[:d_pad, :tile] + res[d_pad:, :tile]               # (D_pad, tile) = n - p
    g2 = res[:d_pad, tile:] + res[d_pad:, tile:]               # (D_pad, tile) = 2a-p-n

    diff = jnp.sum(g1 * g2, axis=0, keepdims=True)             # (1, tile) = dp - dn
    losses = jnp.maximum(diff + margin, 0.0)                   # F.relu(...)

    # Zero out padded triplet slots in the last tile.
    pos = i * tile + lax.broadcasted_iota(jnp.int32, (1, tile), 1)
    losses = jnp.where(pos < num_triplets, losses, 0.0)

    # Per-tile partial sum, written as a small lane-dense (1, 8, 128) block.
    tile_sum = jnp.sum(losses)
    out_ref[...] = jnp.broadcast_to(tile_sum, (1, 8, 128))


def online_triplet_loss(embeddings, triplets, margin, size_average=True, tile=1024):
    """Forward pass of OnlineTripletLoss given precomputed (T, 3) triplets."""
    N, D = embeddings.shape
    trip_np = np.asarray(triplets, dtype=np.int32)
    T = int(trip_np.shape[0])
    if T == 0:
        # PyTorch: mean of an empty tensor is NaN; sum is 0.
        return jnp.float32(float("nan")) if size_average else jnp.float32(0.0)
    # Out-of-range indices would silently gather a zero embedding; catch here.
    assert trip_np.min() >= 0 and trip_np.max() < N, "triplet index out of range"

    n_pad = _round_up(N, 128)        # MXU contraction / selector sublanes
    d_pad = _round_up(D, 128)        # gathered-embedding sublanes

    # Tile selection: multiple of 128, no bigger than needed, and split so the
    # grid has >= 2 steps for modest T (keeps both v7x TensorCores busy).
    tile = max(128, (min(int(tile), 2048) // 128) * 128)
    tile = min(tile, max(128, _round_up(T, 128)))
    if T > 128 and T <= tile:
        tile = max(128, _round_up((T + 1) // 2, 128))
    t_pad = _round_up(T, tile)
    num_tiles = t_pad // tile

    # Transposed, zero-padded table split into an exact bf16 hi/lo pair stacked
    # along sublanes: (2*D_pad, N_pad). Columns are embeddings.
    embT32 = jnp.zeros((d_pad, n_pad), jnp.float32)
    embT32 = embT32.at[:D, :N].set(jnp.asarray(embeddings, jnp.float32).T)
    embT_hi = embT32.astype(jnp.bfloat16)
    embT_lo = (embT32 - embT_hi.astype(jnp.float32)).astype(jnp.bfloat16)
    embT_split = jnp.concatenate([embT_hi, embT_lo], axis=0)   # (2*d_pad, n_pad)

    # Index table with the long (triplet) axis last; padded slots point at row 0
    # and are masked inside the kernel.
    idx = jnp.zeros((3, t_pad), jnp.int32).at[:, :T].set(jnp.asarray(trip_np).T)

    # Right-size the scoped VMEM request from actual block/intermediate sizes.
    bytes_live = (
        2 * (2 * d_pad) * n_pad * 2          # resident bf16 table (double-buffered)
        + 2 * 3 * tile * 4                   # idx blocks
        + 2 * 8 * 128 * 4                    # output blocks
        + 3 * n_pad * tile * 4               # f32 one-hots
        + 2 * n_pad * (2 * tile) * 2         # bf16 selectors + concatenated copy
        + (2 * d_pad) * (2 * tile) * 4       # matmul result (f32)
        + 3 * d_pad * tile * 4)              # g1, g2, product
    vmem_limit = int(min(32 * 1024 * 1024, max(16 * 1024 * 1024, 2 * bytes_live)))

    kernel = functools.partial(
        _triplet_tile_kernel, margin=float(margin), num_triplets=T)

    partials = pl.pallas_call(
        kernel,
        out_shape=jax.ShapeDtypeStruct((num_tiles, 8, 128), jnp.float32),
        grid=(num_tiles,),
        in_specs=[
            # (3, tile) index tile per grid step (lane-major triplet axis).
            pl.BlockSpec((3, tile), lambda i: (0, i)),
            # Full hi/lo-split embedding table, resident across the whole grid.
            pl.BlockSpec((2 * d_pad, n_pad), lambda i: (0, 0)),
        ],
        out_specs=pl.BlockSpec((1, 8, 128), lambda i: (i, 0, 0)),
        compiler_params=pltpu.CompilerParams(
            dimension_semantics=("parallel",),      # independent tiles (v7x dual-TC)
            vmem_limit_bytes=vmem_limit,
        ),
    )(idx, embT_split)

    total = jnp.sum(partials[:, 0, 0])              # num_tiles partial sums
    return total / T if size_average else total


if __name__ == "__main__":
    key = jax.random.PRNGKey(0)
    N, D = 8, 32
    margin = 1.0

    embeddings = jax.random.normal(key, (N, D), dtype=jnp.float32)
    # Deterministic targets (>= 2 samples per class so triplets exist).
    labels = np.array([0, 0, 1, 1, 2, 2, 0, 1], dtype=np.int32)
    triplets_np = all_triplet_selector(labels)                # (T, 3) int32, T = 36

    loss = online_triplet_loss(embeddings, triplets_np, margin, size_average=True)
    loss = jax.block_until_ready(loss)

    # Pure-JAX reference of the PyTorch forward.
    trip = jnp.asarray(triplets_np)
    a = embeddings[trip[:, 0]]
    p = embeddings[trip[:, 1]]
    n = embeddings[trip[:, 2]]
    dp = jnp.sum((a - p) ** 2, axis=1)
    dn = jnp.sum((a - n) ** 2, axis=1)
    ref = jnp.mean(jnp.maximum(dp - dn + margin, 0.0))

    # Tolerance reflects the 2-term bf16 hi/lo gather (~2^-16 relative per
    # element); a broken gather/fusion would be off by O(1).
    tol = 1e-3 * max(1.0, abs(float(ref)))
    assert abs(float(loss) - float(ref)) < tol, (float(loss), float(ref))
    print("KERNEL_OK")
</pallas_src>

<mosaic_0001>
module attributes {stable_mosaic.version = 11 : i64} {
  func.func @_triplet_tile_kernel(%arg0: i32, %arg1: memref<3x128xi32, #tpu.memory_space<vmem>>, %arg2: memref<256x128xbf16, #tpu.memory_space<vmem>>, %arg3: memref<1x8x128xf32, #tpu.memory_space<vmem>>) attributes {dimension_semantics = [#tpu.dimension_semantics<parallel>], iteration_bounds = array<i64: 1>, scalar_prefetch = 0 : i64, scratch_operands = 0 : i64, tpu.core_type = #tpu.core_type<tc>, window_params = [{transform_indices = @transform_0, window_bounds = array<i64: 3, 128>}, {pipeline_mode = #tpu.pipeline_mode<synchronous>, transform_indices = @transform_1, window_bounds = array<i64: 256, 128>}, {transform_indices = @transform_2, window_bounds = array<i64: 1, 8, 128>}]} {
    %c0 = arith.constant 0 : index
    %c0_0 = arith.constant 0 : index
    %0 = vector.load %arg2[%c0, %c0_0] : memref<256x128xbf16, #tpu.memory_space<vmem>>, vector<256x128xbf16>
    %c0_1 = arith.constant 0 : index
    %c0_2 = arith.constant 0 : index
    %1 = vector.load %arg1[%c0_1, %c0_2] : memref<3x128xi32, #tpu.memory_space<vmem>>, vector<3x128xi32>
    %2 = tpu.iota {dimensions = array<i32: 0>} : vector<128x1xi32>
    %3 = vector.extract_strided_slice %1 {offsets = [0, 0], sizes = [1, 128], strides = [1, 1]} : vector<3x128xi32> to vector<1x128xi32>
    %4 = vector.broadcast %2 : vector<128x1xi32> to vector<128x128xi32>
    %5 = vector.broadcast %3 : vector<1x128xi32> to vector<128x128xi32>
    %6 = arith.cmpi eq, %4, %5 : vector<128x128xi32>
    %7 = arith.extui %6 : vector<128x128xi1> to vector<128x128xi32>
    %8 = arith.sitofp %7 : vector<128x128xi32> to vector<128x128xf32>
    %9 = vector.extract_strided_slice %1 {offsets = [1, 0], sizes = [1, 128], strides = [1, 1]} : vector<3x128xi32> to vector<1x128xi32>
    %10 = vector.broadcast %2 : vector<128x1xi32> to vector<128x128xi32>
    %11 = vector.broadcast %9 : vector<1x128xi32> to vector<128x128xi32>
    %12 = arith.cmpi eq, %10, %11 : vector<128x128xi32>
    %13 = arith.extui %12 : vector<128x128xi1> to vector<128x128xi32>
    %14 = arith.sitofp %13 : vector<128x128xi32> to vector<128x128xf32>
    %15 = vector.extract_strided_slice %1 {offsets = [2, 0], sizes = [1, 128], strides = [1, 1]} : vector<3x128xi32> to vector<1x128xi32>
    %16 = vector.broadcast %2 : vector<128x1xi32> to vector<128x128xi32>
    %17 = vector.broadcast %15 : vector<1x128xi32> to vector<128x128xi32>
    %18 = arith.cmpi eq, %16, %17 : vector<128x128xi32>
    %19 = arith.extui %18 : vector<128x128xi1> to vector<128x128xi32>
    %20 = arith.sitofp %19 : vector<128x128xi32> to vector<128x128xf32>
    %21 = arith.subf %20, %14 : vector<128x128xf32>
    %22 = arith.truncf %21 : vector<128x128xf32> to vector<128x128xbf16>
    %cst = arith.constant 2.000000e+00 : f32
    %23 = vector.broadcast %cst : f32 to vector<128x128xf32>
    %24 = arith.mulf %23, %8 : vector<128x128xf32>
    %25 = arith.subf %24, %14 : vector<128x128xf32>
    %26 = arith.subf %25, %20 : vector<128x128xf32>
    %27 = arith.truncf %26 : vector<128x128xf32> to vector<128x128xbf16>
    %28 = tpu.concatenate %22, %27 in 1 : vector<128x128xbf16>, vector<128x128xbf16> -> vector<128x256xbf16>
    %cst_3 = arith.constant dense<0.000000e+00> : vector<256x256xf32>
    %29 = tpu.matmul %0, %28, %cst_3 {dimension_numbers = #tpu.dot_dimension_numbers<[1], [0], [0], [1], [0, 0, 1, 1], [], []>} : vector<256x128xbf16>, vector<128x256xbf16>, vector<256x256xf32> -> vector<256x256xf32>
    %30 = vector.extract_strided_slice %29 {offsets = [0, 0], sizes = [128, 128], strides = [1, 1]} : vector<256x256xf32> to vector<128x128xf32>
    %31 = vector.extract_strided_slice %29 {offsets = [128, 0], sizes = [128, 128], strides = [1, 1]} : vector<256x256xf32> to vector<128x128xf32>
    %32 = arith.addf %30, %31 : vector<128x128xf32>
    %33 = vector.extract_strided_slice %29 {offsets = [0, 128], sizes = [128, 128], strides = [1, 1]} : vector<256x256xf32> to vector<128x128xf32>
    %34 = vector.extract_strided_slice %29 {offsets = [128, 128], sizes = [128, 128], strides = [1, 1]} : vector<256x256xf32> to vector<128x128xf32>
    %35 = arith.addf %33, %34 : vector<128x128xf32>
    %36 = arith.mulf %32, %35 : vector<128x128xf32>
    %cst_4 = arith.constant dense<0.000000e+00> : vector<128xf32>
    %37 = vector.multi_reduction <add>, %36, %cst_4 [0] : vector<128x128xf32> to vector<128xf32>
    %38 = vector.shape_cast %37 : vector<128xf32> to vector<1x128xf32>
    %cst_5 = arith.constant 1.000000e+00 : f32
    %39 = vector.broadcast %cst_5 : f32 to vector<1x128xf32>
    %40 = arith.addf %38, %39 : vector<1x128xf32>
    %cst_6 = arith.constant 0.000000e+00 : f32
    %41 = vector.broadcast %cst_6 : f32 to vector<1x128xf32>
    %42 = arith.maximumf %40, %41 : vector<1x128xf32>
    %c128_i32 = arith.constant 128 : i32
    %43 = arith.muli %arg0, %c128_i32 : i32
    %44 = tpu.iota {dimensions = array<i32: 1>} : vector<1x128xi32>
    %45 = vector.broadcast %43 : i32 to vector<1x128xi32>
    %46 = arith.addi %45, %44 : vector<1x128xi32>
    %c36_i32 = arith.constant 36 : i32
    %47 = vector.broadcast %c36_i32 : i32 to vector<1x128xi32>
    %48 = arith.cmpi slt, %46, %47 : vector<1x128xi32>
    %cst_7 = arith.constant 0.000000e+00 : f32
    %49 = vector.broadcast %cst_7 : f32 to vector<1x128xf32>
    %50 = arith.select %48, %42, %49 : vector<1x128xi1>, vector<1x128xf32>
    %51 = vector.shape_cast %50 : vector<1x128xf32> to vector<1x1x128xf32>
    %cst_8 = arith.constant dense<0.000000e+00> : vector<1xf32>
    %52 = vector.multi_reduction <add>, %51, %cst_8 [1, 2] : vector<1x1x128xf32> to vector<1xf32>
    %53 = vector.shape_cast %52 : vector<1xf32> to vector<1x1x1xf32>
    %54 = vector.extract %53[0, 0, 0] : f32 from vector<1x1x1xf32>
    %55 = vector.broadcast %54 : f32 to vector<1x8x128xf32>
    %c0_9 = arith.constant 0 : index
    %c0_10 = arith.constant 0 : index
    %c0_11 = arith.constant 0 : index
    %56 = vector.load %arg3[%c0_9, %c0_10, %c0_11] : memref<1x8x128xf32, #tpu.memory_space<vmem>>, vector<1x8x128xf32>
    tpu.vector_store %arg3[%c0_9, %c0_10, %c0_11], %55 {strides = array<i32>} : memref<1x8x128xf32, #tpu.memory_space<vmem>>, vector<1x8x128xf32>,
    return
  }
  func.func @transform_0(%arg0: i32) -> (i32, i32) {
    %c0_i32 = arith.constant 0 : i32
    %c0_i32_0 = arith.constant 0 : i32
    return %c0_i32, %arg0 : i32, i32
  }
  func.func @transform_1(%arg0: i32) -> (i32, i32) {
    %c0_i32 = arith.constant 0 : i32
    %c0_i32_0 = arith.constant 0 : i32
    %c0_i32_1 = arith.constant 0 : i32
    return %c0_i32, %c0_i32_0 : i32, i32
  }
  func.func @transform_2(%arg0: i32) -> (i32, i32, i32) {
    %c0_i32 = arith.constant 0 : i32
    %c0_i32_0 = arith.constant 0 : i32
    %c0_i32_1 = arith.constant 0 : i32
    return %arg0, %c0_i32, %c0_i32_0 : i32, i32, i32
  }
}

</mosaic_0001>

<bundles_post_ra>
// kernel: tpu_custom_call.1
= control target key start
LH: loop header
LB: loop body
LE: loop exit
PB: predicated region body
PF: predicated region fallthrough
CT: control target
= control target key end

     0   :  { %7 = vsyncpa [#allocation3], 0  ;;  %s1175_s0 = inlined_call_operand.hbm [shape: s32[3,128], index: 0, kind: input, shape index: {}]   ;;  %s1176_s1 = inlined_call_operand.hbm [shape: bf16[256,128], index: 1, kind: input, shape index: {}]   ;;  %s1177_s2 = inlined_call_operand.hbm [shape: f32[1,8,128], index: 2, kind: output, shape index: {}]  }
   0x1   :  { %8 = vsyncpa [#allocation6], 0 }
   0x2   :  { %9 = vsyncpa [#allocation4], 0  ;;  %s930_s9 = smov [#allocation2]   ;;  %s931_s11 = smov [#allocation5]  }
   0x3   :  { %s16_s10 = sshll.u32 %s930_s9, 4  ;;  %s25_s12 = sshll.u32 %s931_s11, 4  ;;  %s17_s10 = int_to_ptr.vmem [resolvable:$true] %s16_s10  ;;  %s952_s12 = int_to_ptr.vmem [resolvable:$true] %s25_s12 }
   0x4   :  { %s858_s15 = scalar_lea.hbm %s1175_s0, 64 }
   0x5   :  { %p859_p0 = scmp.ne.s32.totalorder %s1175_s0, %s858_s15  ;;  %p862_p1 = scmp.lt.u32.totalorder %s858_s15, %s1175_s0 }
   0x7   :  { %p864_p2 = pnand %p862_p1, %p859_p0 }
   0x9   :  { %867 = shalt.err (!%p864_p2)
}
   0xa   :  { %s868_s20 = scalar_lea.vmem %s17_s10, 64  ;;  %p873_p4 = scmp.lt.s32.totalorder %s17_s10, %s17_s10 }
   0xb   :  { %p869_p3 = scmp.ne.s32.totalorder %s17_s10, %s868_s20  ;;  %p874_p5 = scmp.lt.s32.totalorder %s868_s20, %s868_s20 }
   0xd   :  { %p875_p6 = por %p874_p5, %p873_p4 }
   0xf   :  { %p876_p7 = pnand %p875_p6, %p869_p3 }
  0x11   :  { %879 = shalt.err (!%p876_p7)
}
  0x12   :  { %19 = dma.hbm_to_vmem [thread:$0]  %s1175_s0, 64, %s17_s10, [#allocation3]  }
  0x13   :  { %s880_s25 = scalar_lea.hbm %s1176_s1, 2048 }
  0x14   :  { %p881_p8 = scmp.ne.s32.totalorder %s1176_s1, %s880_s25  ;;  %p884_p9 = scmp.lt.u32.totalorder %s880_s25, %s1176_s1 }
  0x16   :  { %p886_p10 = pnand %p884_p9, %p881_p8 }
  0x18   :  { %889 = shalt.err (!%p886_p10)
}
  0x19   :  { %s890_s30 = scalar_lea.vmem %s952_s12, 2048  ;;  %p895_p12 = scmp.lt.s32.totalorder %s952_s12, %s952_s12 }
  0x1a   :  { %p891_p11 = scmp.ne.s32.totalorder %s952_s12, %s890_s30  ;;  %p896_p13 = scmp.lt.s32.totalorder %s890_s30, %s890_s30 }
  0x1c   :  { %p897_p0 = por %p896_p13, %p895_p12 }
  0x1e   :  { %p898_p1 = pnand %p897_p0, %p891_p11 }
  0x20   :  { %901 = shalt.err (!%p898_p1)
}
  0x21   :  { %s932_s0 = smov 64   ;;  %s933_s3 = smov 4  }
  0x22   :  { %31 = dma.hbm_to_vmem [thread:$0]  %s1176_s1, 2048, %s952_s12, [#allocation6], %s932_s0, %s932_s0, %s933_s3  }
  0x23   :  { %924 = dma.done.wait [#allocation3], 64  }
  0x24   :  { %925 = vsyncadd [#allocation3], 4294967232 }
  0x25   :  { %926 = dma.done.wait [#allocation6], 2048  }
  0x26   :  { %927 = vsyncadd [#allocation6], 4294965248  ;;  %v72_v0 = vlaneseq  ;;  %v934_v1 = vmov 0   ;;  %v71_v14 = vld [vmem:[#allocation2] sm:$0x7]  ;;  %v935_v25 = vmov 0.0  }
  0x27   :  { %453 = vmatprep.mubr.bf16.mxu0 %v934_v1  ;;  %533 = vmatprep.mubr.bf16.mxu1 %v934_v1  ;;  %s936_s1 = smov [#allocation7]  }
  0x28   :  { %v73_v2 = vshrl.u32 %v72_v0, 7  ;;  %s711_s6 = sshll.u32 %s936_s1, 4  ;;  %s712_s6 = int_to_ptr.vmem [resolvable:$true] %s711_s6 }
  0x29   :  { %s902_s8 = scalar_lea.vmem %s712_s6, 128  ;;  %p907_p3 = scmp.lt.s32.totalorder %s712_s6, %s712_s6 }
  0x2a   :  { %v91_v3 = vsub.s32 0, %v73_v2  ;;  %v143_v4 = vsub.s32 1, %v73_v2  ;;  %v195_v5 = vsub.s32 2, %v73_v2  ;;  %v74_v6 = vadd.s32 8, %v73_v2  ;;  %p903_p2 = scmp.ne.s32.totalorder %s712_s6, %s902_s8  ;;  %p908_p4 = scmp.lt.s32.totalorder %s902_s8, %s902_s8 }
  0x2b   :  { %v75_v7 = vadd.s32 16, %v73_v2  ;;  %v76_v8 = vadd.s32 24, %v73_v2  ;;  %v986_v9 = vadd.s32 32, %v73_v2  ;;  %v988_v10 = vadd.s32 40, %v73_v2 }
  0x2c   :  { %v990_v11 = vadd.s32 48, %v73_v2  ;;  %v992_v12 = vadd.s32 56, %v73_v2  ;;  %v994_v13 = vadd.s32 64, %v73_v2  ;;  %v996_v15 = vadd.s32 72, %v73_v2  ;;  %p909_p5 = por %p908_p4, %p907_p3 }
  0x2d   :  { %v998_v16 = vadd.s32 80, %v73_v2  ;;  %v1000_v17 = vadd.s32 88, %v73_v2  ;;  %v1002_v18 = vadd.s32 96, %v73_v2  ;;  %v1004_v19 = vrot.slane %v71_v14, %v91_v3 }
  0x2e   :  { %v1006_v20 = vrot.slane %v71_v14, %v143_v4  ;;  %v1008_v21 = vrot.slane %v71_v14, %v195_v5  ;;  %v1010_v22 = vadd.s32 104, %v73_v2  ;;  %v1012_v23 = vadd.s32 112, %v73_v2  ;;  %p910_p6 = pnand %p909_p5, %p903_p2 }
  0x2f   :  { %v1014_v24 = vadd.s32 120, %v73_v2  ;;  %vm93_vm0 = vcmp.eq.s32.totalorder %v73_v2, %v1004_v19  ;;  %vm94_vm1 = vcmp.eq.s32.totalorder %v74_v6, %v1004_v19  ;;  %vm95_vm6 = vcmp.eq.s32.totalorder %v75_v7, %v1004_v19 }
  0x30   :  { %vm145_vm2 = vcmp.eq.s32.totalorder %v73_v2, %v1006_v20  ;;  %vm146_vm3 = vcmp.eq.s32.totalorder %v74_v6, %v1006_v20  ;;  %v721_v26 = vsel %vm93_vm0, 1.0, %v935_v25  ;;  %v722_v27 = vsel %vm94_vm1, 1.0, %v935_v25 }
  0x31   :  { %v737_v28 = vsel %vm145_vm2, 1.0, %v935_v25  ;;  %v738_v29 = vsel %vm146_vm3, 1.0, %v935_v25  ;;  %vm197_vm4 = vcmp.eq.s32.totalorder %v73_v2, %v1008_v21  ;;  %vm198_vm5 = vcmp.eq.s32.totalorder %v74_v6, %v1008_v21 }
  0x32   :  { %v269_v30 = vmul.f32 2.0, %v721_v26  ;;  %v270_v31 = vmul.f32 2.0, %v722_v27  ;;  %v753_v32 = vsel %vm197_vm4, 1.0, %v935_v25  ;;  %v754_v33 = vsel %vm198_vm5, 1.0, %v935_v25 }
  0x33   :  { %vm96_vm7 = vcmp.eq.s32.totalorder %v76_v8, %v1004_v19  ;;  %v245_v36 = vsub.f32 %v753_v32, %v737_v28  ;;  %v246_v37 = vsub.f32 %v754_v33, %v738_v29  ;;  %v723_v38 = vsel %vm95_vm6, 1.0, %v935_v25 }
  0x34   :  { %v285_v34 = vsub.f32 %v269_v30, %v737_v28  ;;  %v286_v35 = vsub.f32 %v270_v31, %v738_v29  ;;  %v724_v39 = vsel %vm96_vm7, 1.0, %v935_v25  ;;  %vm147_vm8 = vcmp.eq.s32.totalorder %v75_v7, %v1006_v20 }
  0x35   :  { %vm148_vm9 = vcmp.eq.s32.totalorder %v76_v8, %v1006_v20  ;;  %v261_v42 = vpack.c.bf16 %v246_v37, %v245_v36  ;;  %v739_v43 = vsel %vm147_vm8, 1.0, %v935_v25  ;;  %vm199_vm10 = vcmp.eq.s32.totalorder %v75_v7, %v1008_v21 }
  0x36   :  { %v301_v40 = vsub.f32 %v285_v34, %v753_v32  ;;  %v302_v41 = vsub.f32 %v286_v35, %v754_v33  ;;  %v740_v44 = vsel %vm148_vm9, 1.0, %v935_v25  ;;  %vm200_vm11 = vcmp.eq.s32.totalorder %v76_v8, %v1008_v21 }
  0x37   :  { %v271_v45 = vmul.f32 2.0, %v723_v38  ;;  %v755_v47 = vsel %vm199_vm10, 1.0, %v935_v25  ;;  %v756_v48 = vsel %vm200_vm11, 1.0, %v935_v25  ;;  %v272_v49 = vmul.f32 2.0, %v724_v39 }
  0x38   :  { %v317_v46 = vpack.c.bf16 %v302_v41, %v301_v40  ;;  %v247_v51 = vsub.f32 %v755_v47, %v739_v43  ;;  %v248_v52 = vsub.f32 %v756_v48, %v740_v44  ;;  %vm97_vm12 = vcmp.eq.s32.totalorder %v986_v9, %v1004_v19 }
  0x39   :  { %v287_v50 = vsub.f32 %v271_v45, %v739_v43  ;;  %v288_v53 = vsub.f32 %v272_v49, %v740_v44  ;;  %vm98_vm13 = vcmp.eq.s32.totalorder %v988_v10, %v1004_v19  ;;  %v725_v54 = vsel %vm97_vm12, 1.0, %v935_v25 }
  0x3a   :  { %421 = vmatprep.subr.bf16.mxu0 %v317_v46  ;;  %785 = vmatprep.subr.bf16.mxu1 %v317_v46  ;;  %vm149_vm14 = vcmp.eq.s32.totalorder %v986_v9, %v1006_v20  ;;  %v262_v56 = vpack.c.bf16 %v248_v52, %v247_v51  ;;  %v726_v57 = vsel %vm98_vm13, 1.0, %v935_v25  ;;  %vm150_vm15 = vcmp.eq.s32.totalorder %v988_v10, %v1006_v20 }
  0x3b   :  { %422 = vmatpush1.bf16.msra.mxu0 %v261_v42  ;;  %793 = vmatpush1.bf16.msra.mxu1 %v261_v42  ;;  %v303_v55 = vsub.f32 %v287_v50, %v755_v47  ;;  %v304_v58 = vsub.f32 %v288_v53, %v756_v48  ;;  %v741_v59 = vsel %vm149_vm14, 1.0, %v935_v25  ;;  %v742_v60 = vsel %vm150_vm15, 1.0, %v935_v25 }
  0x3c   :  { %vm201_vm0 = vcmp.eq.s32.totalorder %v986_v9, %v1008_v21  ;;  %vm202_vm1 = vcmp.eq.s32.totalorder %v988_v10, %v1008_v21  ;;  %v273_v62 = vmul.f32 2.0, %v725_v54  ;;  %v274_v63 = vmul.f32 2.0, %v726_v57 }
  0x3d   :  { %v757_v61 = vsel %vm201_vm0, 1.0, %v935_v25  ;;  %v318_v2 = vpack.c.bf16 %v304_v58, %v303_v55  ;;  %v758_v3 = vsel %vm202_vm1, 1.0, %v935_v25  ;;  %vm99_vm2 = vcmp.eq.s32.totalorder %v990_v11, %v1004_v19 }
  0x3e   :  { %v249_v4 = vsub.f32 %v757_v61, %v741_v59  ;;  %v289_v5 = vsub.f32 %v273_v62, %v741_v59  ;;  %v290_v6 = vsub.f32 %v274_v63, %v742_v60  ;;  %v250_v7 = vsub.f32 %v758_v3, %v742_v60 }
  0x3f   :  { %vm100_vm3 = vcmp.eq.s32.totalorder %v992_v12, %v1004_v19  ;;  %423 = vmatprep.subr.bf16.mxu0 %v318_v2  ;;  %786 = vmatprep.subr.bf16.mxu1 %v318_v2  ;;  %v727_v8 = vsel %vm99_vm2, 1.0, %v935_v25  ;;  %vm151_vm4 = vcmp.eq.s32.totalorder %v990_v11, %v1006_v20  ;;  %vm152_vm5 = vcmp.eq.s32.totalorder %v992_v12, %v1006_v20 }
  0x40   :  { %v728_v9 = vsel %vm100_vm3, 1.0, %v935_v25  ;;  %424 = vmatpush1.bf16.msra.mxu0 %v262_v56  ;;  %794 = vmatpush1.bf16.msra.mxu1 %v262_v56  ;;  %v305_v10 = vsub.f32 %v289_v5, %v757_v61  ;;  %v306_v14 = vsub.f32 %v290_v6, %v758_v3  ;;  %v263_v26 = vpack.c.bf16 %v250_v7, %v249_v4 }
  0x41   :  { %v743_v27 = vsel %vm151_vm4, 1.0, %v935_v25  ;;  %v744_v28 = vsel %vm152_vm5, 1.0, %v935_v25  ;;  %vm203_vm6 = vcmp.eq.s32.totalorder %v990_v11, %v1008_v21  ;;  %vm204_vm7 = vcmp.eq.s32.totalorder %v992_v12, %v1008_v21 }
  0x42   :  { %v275_v29 = vmul.f32 2.0, %v727_v8  ;;  %v319_v30 = vpack.c.bf16 %v306_v14, %v305_v10  ;;  %v759_v31 = vsel %vm203_vm6, 1.0, %v935_v25  ;;  %v760_v32 = vsel %vm204_vm7, 1.0, %v935_v25 }
  0x43   :  { %v276_v33 = vmul.f32 2.0, %v728_v9  ;;  %v251_v35 = vsub.f32 %v759_v31, %v743_v27  ;;  %v252_v36 = vsub.f32 %v760_v32, %v744_v28  ;;  %vm101_vm8 = vcmp.eq.s32.totalorder %v994_v13, %v1004_v19 }
  0x44   :  { %v291_v34 = vsub.f32 %v275_v29, %v743_v27  ;;  %425 = vmatprep.subr.bf16.mxu0 %v319_v30  ;;  %787 = vmatprep.subr.bf16.mxu1 %v319_v30  ;;  %vm102_vm9 = vcmp.eq.s32.totalorder %v996_v15, %v1004_v19  ;;  %v729_v11 = vsel %vm101_vm8, 1.0, %v935_v25  ;;  %vm153_vm10 = vcmp.eq.s32.totalorder %v994_v13, %v1006_v20 }
  0x45   :  { %v292_v37 = vsub.f32 %v276_v33, %v744_v28  ;;  %426 = vmatpush1.bf16.msra.mxu0 %v263_v26  ;;  %795 = vmatpush1.bf16.msra.mxu1 %v263_v26  ;;  %v264_v38 = vpack.c.bf16 %v252_v36, %v251_v35  ;;  %v730_v39 = vsel %vm102_vm9, 1.0, %v935_v25  ;;  %vm154_vm11 = vcmp.eq.s32.totalorder %v996_v15, %v1006_v20 }
  0x46   :  { %v307_v12 = vsub.f32 %v291_v34, %v759_v31  ;;  %v745_v41 = vsel %vm153_vm10, 1.0, %v935_v25  ;;  %v746_v42 = vsel %vm154_vm11, 1.0, %v935_v25  ;;  %vm205_vm12 = vcmp.eq.s32.totalorder %v994_v13, %v1008_v21 }
  0x47   :  { %v308_v40 = vsub.f32 %v292_v37, %v760_v32  ;;  %vm206_vm13 = vcmp.eq.s32.totalorder %v996_v15, %v1008_v21  ;;  %v761_v43 = vsel %vm205_vm12, 1.0, %v935_v25  ;;  %v277_v44 = vmul.f32 2.0, %v729_v11 }
  0x48   :  { %v278_v45 = vmul.f32 2.0, %v730_v39  ;;  %v762_v47 = vsel %vm206_vm13, 1.0, %v935_v25  ;;  %v253_v48 = vsub.f32 %v761_v43, %v745_v41  ;;  %vm103_vm14 = vcmp.eq.s32.totalorder %v998_v16, %v1004_v19 }
  0x49   :  { %v320_v46 = vpack.c.bf16 %v308_v40, %v307_v12  ;;  %v293_v49 = vsub.f32 %v277_v44, %v745_v41  ;;  %v254_v51 = vsub.f32 %v762_v47, %v746_v42  ;;  %vm104_vm15 = vcmp.eq.s32.totalorder %v1000_v17, %v1004_v19 }
  0x4a   :  { %v294_v50 = vsub.f32 %v278_v45, %v746_v42  ;;  %v731_v13 = vsel %vm103_vm14, 1.0, %v935_v25  ;;  %v732_v15 = vsel %vm104_vm15, 1.0, %v935_v25  ;;  %vm155_vm0 = vcmp.eq.s32.totalorder %v998_v16, %v1006_v20  ;;  %v845_v45 = vld [vmem:[#allocation5 + $0x48] sm:$0xff]  }
  0x4b   :  { %427 = vmatprep.subr.bf16.mxu0 %v320_v46  ;;  %788 = vmatprep.subr.bf16.mxu1 %v320_v46  ;;  %vm156_vm1 = vcmp.eq.s32.totalorder %v1000_v17, %v1006_v20  ;;  %v309_v52 = vsub.f32 %v293_v49, %v761_v43  ;;  %v265_v54 = vpack.c.bf16 %v254_v51, %v253_v48  ;;  %v747_v55 = vsel %vm155_vm0, 1.0, %v935_v25  ;;  %v846_v46 = vld [vmem:[#allocation5 + $0x10] sm:$0xff]   ;;  %v848_v48 = vld [vmem:[#allocation5 + $0x18] sm:$0xff]   ;;  %v851_v51 = vld [vmem:[#allocation5 + $0x60] sm:$0xff]  }
  0x4c   :  { %428 = vmatpush1.bf16.msra.mxu0 %v264_v38  ;;  %796 = vmatpush1.bf16.msra.mxu1 %v264_v38  ;;  %v310_v53 = vsub.f32 %v294_v50, %v762_v47  ;;  %v748_v56 = vsel %vm156_vm1, 1.0, %v935_v25  ;;  %vm207_vm2 = vcmp.eq.s32.totalorder %v998_v16, %v1008_v21  ;;  %vm208_vm3 = vcmp.eq.s32.totalorder %v1000_v17, %v1008_v21  ;;  %v847_v47 = vld [vmem:[#allocation5 + $0x50] sm:$0xff]   ;;  %v849_v49 = vld [vmem:[#allocation5 + $0x58] sm:$0xff]   ;;  %v850_v50 = vld [vmem:[#allocation5 + $0x20] sm:$0xff]  }
  0x4d   :  { %v279_v57 = vmul.f32 2.0, %v731_v13  ;;  %v763_v59 = vsel %vm207_vm2, 1.0, %v935_v25  ;;  %v764_v60 = vsel %vm208_vm3, 1.0, %v935_v25  ;;  %v280_v61 = vmul.f32 2.0, %v732_v15  ;;  %v852_v13 = vld [vmem:[#allocation5 + $0x28] sm:$0xff]  }
  0x4e   :  { %v321_v58 = vpack.c.bf16 %v310_v53, %v309_v52  ;;  %v255_v63 = vsub.f32 %v763_v59, %v747_v55  ;;  %v256_v2 = vsub.f32 %v764_v60, %v748_v56  ;;  %vm105_vm4 = vcmp.eq.s32.totalorder %v1002_v18, %v1004_v19  ;;  %v853_v15 = vld [vmem:[#allocation5 + $0x68] sm:$0xff]   ;;  %v854_v52 = vld [vmem:[#allocation5 + $0x30] sm:$0xff]  }
  0x4f   :  { %v295_v62 = vsub.f32 %v279_v57, %v747_v55  ;;  %v296_v3 = vsub.f32 %v280_v61, %v748_v56  ;;  %vm106_vm5 = vcmp.eq.s32.totalorder %v1010_v22, %v1004_v19  ;;  %v733_v16 = vsel %vm105_vm4, 1.0, %v935_v25  ;;  %v855_v53 = vld [vmem:[#allocation5 + $0x70] sm:$0xff]   ;;  %v857_v55 = vld [vmem:[#allocation5 + $0x78] sm:$0xff]  }
  0x50   :  { %429 = vmatprep.subr.bf16.mxu0 %v321_v58  ;;  %789 = vmatprep.subr.bf16.mxu1 %v321_v58  ;;  %vm157_vm6 = vcmp.eq.s32.totalorder %v1002_v18, %v1006_v20  ;;  %v266_v4 = vpack.c.bf16 %v256_v2, %v255_v63  ;;  %v734_v5 = vsel %vm106_vm5, 1.0, %v935_v25  ;;  %vm158_vm7 = vcmp.eq.s32.totalorder %v1010_v22, %v1006_v20 }
  0x51   :  { %430 = vmatpush1.bf16.msra.mxu0 %v265_v54  ;;  %797 = vmatpush1.bf16.msra.mxu1 %v265_v54  ;;  %v311_v17 = vsub.f32 %v295_v62, %v763_v59  ;;  %v312_v6 = vsub.f32 %v296_v3, %v764_v60  ;;  %v749_v7 = vsel %vm157_vm6, 1.0, %v935_v25  ;;  %v750_v8 = vsel %vm158_vm7, 1.0, %v935_v25  ;;  %v856_v54 = vld [vmem:[#allocation5 + $0x38] sm:$0xff]  }
  0x52   :  { %vm209_vm8 = vcmp.eq.s32.totalorder %v1002_v18, %v1008_v21  ;;  %vm210_vm9 = vcmp.eq.s32.totalorder %v1010_v22, %v1008_v21  ;;  %v281_v10 = vmul.f32 2.0, %v733_v16  ;;  %v282_v14 = vmul.f32 2.0, %v734_v5 }
  0x53   :  { %v765_v9 = vsel %vm209_vm8, 1.0, %v935_v25  ;;  %v322_v26 = vpack.c.bf16 %v312_v6, %v311_v17  ;;  %v766_v27 = vsel %vm210_vm9, 1.0, %v935_v25  ;;  %vm107_vm10 = vcmp.eq.s32.totalorder %v1012_v23, %v1004_v19 }
  0x54   :  { %v257_v28 = vsub.f32 %v765_v9, %v749_v7  ;;  %v297_v29 = vsub.f32 %v281_v10, %v749_v7  ;;  %v298_v30 = vsub.f32 %v282_v14, %v750_v8  ;;  %v258_v31 = vsub.f32 %v766_v27, %v750_v8 }
  0x55   :  { %vm108_vm11 = vcmp.eq.s32.totalorder %v1014_v24, %v1004_v19  ;;  %431 = vmatprep.subr.bf16.mxu0 %v322_v26  ;;  %790 = vmatprep.subr.bf16.mxu1 %v322_v26  ;;  %v735_v18 = vsel %vm107_vm10, 1.0, %v935_v25  ;;  %vm159_vm12 = vcmp.eq.s32.totalorder %v1012_v23, %v1006_v20  ;;  %vm160_vm13 = vcmp.eq.s32.totalorder %v1014_v24, %v1006_v20 }
  0x56   :  { %v736_v22 = vsel %vm108_vm11, 1.0, %v935_v25  ;;  %432 = vmatpush1.bf16.msra.mxu0 %v266_v4  ;;  %798 = vmatpush1.bf16.msra.mxu1 %v266_v4  ;;  %v313_v32 = vsub.f32 %v297_v29, %v765_v9  ;;  %v314_v33 = vsub.f32 %v298_v30, %v766_v27  ;;  %v267_v34 = vpack.c.bf16 %v258_v31, %v257_v28 }
  0x57   :  { %v751_v35 = vsel %vm159_vm12, 1.0, %v935_v25  ;;  %v752_v19 = vsel %vm160_vm13, 1.0, %v935_v25  ;;  %vm211_vm14 = vcmp.eq.s32.totalorder %v1012_v23, %v1008_v21  ;;  %vm212_vm15 = vcmp.eq.s32.totalorder %v1014_v24, %v1008_v21  ;;  %v842_v21 = vld [vmem:[#allocation5] sm:$0xff]  }
  0x58   :  { %v283_v36 = vmul.f32 2.0, %v735_v18  ;;  %v323_v37 = vpack.c.bf16 %v314_v33, %v313_v32  ;;  %v767_v11 = vsel %vm211_vm14, 1.0, %v935_v25  ;;  %v768_v20 = vsel %vm212_vm15, 1.0, %v935_v25  ;;  %v843_v24 = vld [vmem:[#allocation5 + $0x40] sm:$0xff]   ;;  %v844_v25 = vld [vmem:[#allocation5 + $0x8] sm:$0xff]  }
  0x59   :  { %v284_v12 = vmul.f32 2.0, %v736_v22  ;;  %v259_v39 = vsub.f32 %v767_v11, %v751_v35  ;;  %v260_v40 = vsub.f32 %v768_v20, %v752_v19  ;;  %vm692_vm1 = vcmask 1040384  }
  0x5a   :  { %v299_v38 = vsub.f32 %v283_v36, %v751_v35  ;;  %433 = vmatprep.subr.bf16.mxu0 %v323_v37  ;;  %791 = vmatprep.subr.bf16.mxu1 %v323_v37 }
  0x5b   :  { %v300_v41 = vsub.f32 %v284_v12, %v752_v19  ;;  %434 = vmatpush1.bf16.msra.mxu0 %v267_v34  ;;  %799 = vmatpush1.bf16.msra.mxu1 %v267_v34  ;;  %v268_v43 = vpack.c.bf16 %v260_v40, %v259_v39 }
  0x5c   :  { %v315_v42 = vsub.f32 %v299_v38, %v767_v11 }
  0x5d   :  { %v316_v23 = vsub.f32 %v300_v41, %v768_v20 }
  0x5f   :  { %v324_v44 = vpack.c.bf16 %v316_v23, %v315_v42 }
  0x61   :  { %435 = vmatprep.subr.bf16.mxu0 %v324_v44  ;;  %792 = vmatprep.subr.bf16.mxu1 %v324_v44 }
  0x62   :  { %436 = vmatpush1.bf16.msra.mxu0 %v268_v43  ;;  %800 = vmatpush1.bf16.msra.mxu1 %v268_v43 }
  0x65   :  { %454 = vmatmul.mubr.bf16.vlgmr.msra.gmra.mrb[0].mxu0 %v842_v21  ;;  %534 = vmatmul.mubr.bf16.vlgmr.msra.gmra.mrb[0].mxu1 %v843_v24 }
  0x66   :  { %463 = vmatprep.mubr.bf16.mxu0 %v934_v1  ;;  %543 = vmatprep.mubr.bf16.mxu1 %v934_v1 }
  0x6d   :  { %464 = vmatmul.mubr.bf16.gmra.mrb[4].mxu0 %v844_v25  ;;  %544 = vmatmul.mubr.bf16.gmra.mrb[4].mxu1 %v845_v45 }
  0x6e   :  { %473 = vmatprep.mubr.bf16.mxu0 %v934_v1  ;;  %553 = vmatprep.mubr.bf16.mxu1 %v934_v1 }
  0x75   :  { %474 = vmatmul.mubr.bf16.gmra.mrb[8].mxu0 %v846_v46  ;;  %554 = vmatmul.mubr.bf16.gmra.mrb[8].mxu1 %v847_v47 }
  0x76   :  { %483 = vmatprep.mubr.bf16.mxu0 %v934_v1  ;;  %563 = vmatprep.mubr.bf16.mxu1 %v934_v1 }
  0x7d   :  { %484 = vmatmul.mubr.bf16.gmra.mrb[12].mxu0 %v848_v48  ;;  %564 = vmatmul.mubr.bf16.gmra.mrb[12].mxu1 %v849_v49 }
  0x7e   :  { %493 = vmatprep.mubr.bf16.mxu0 %v934_v1  ;;  %573 = vmatprep.mubr.bf16.mxu1 %v934_v1 }
  0x85   :  { %494 = vmatmul.mubr.bf16.gmra.mrb[16].mxu0 %v850_v50  ;;  %574 = vmatmul.mubr.bf16.gmra.mrb[16].mxu1 %v851_v51 }
  0x86   :  { %503 = vmatprep.mubr.bf16.mxu0 %v934_v1  ;;  %583 = vmatprep.mubr.bf16.mxu1 %v934_v1 }
  0x8d   :  { %504 = vmatmul.mubr.bf16.gmra.mrb[20].mxu0 %v852_v13  ;;  %584 = vmatmul.mubr.bf16.gmra.mrb[20].mxu1 %v853_v15 }
  0x8e   :  { %513 = vmatprep.mubr.bf16.mxu0 %v934_v1  ;;  %593 = vmatprep.mubr.bf16.mxu1 %v934_v1 }
  0x95   :  { %514 = vmatmul.mubr.bf16.gmra.mrb[24].mxu0 %v854_v52  ;;  %594 = vmatmul.mubr.bf16.gmra.mrb[24].mxu1 %v855_v53 }
  0x96   :  { %523 = vmatprep.mubr.bf16.mxu0 %v934_v1  ;;  %603 = vmatprep.mubr.bf16.mxu1 %v934_v1 }
  0x9d   :  { %524 = vmatmul.mubr.bf16.gmra.mrb[28].mxu0 %v856_v54  ;;  %604 = vmatmul.mubr.bf16.gmra.mrb[28].mxu1 %v857_v55 }
 0x138   :  { %v455_v56 = vpop.f32.mrb[0].mxu0  ;;  %v535_v57 = vpop.f32.mrb[0].mxu1 }
 0x139   :  { %v614_v58 = vadd.f32 %v535_v57, %v455_v56  ;;  %v457_v59 = vpop.f32.mrb[1].mxu0  ;;  %v537_v60 = vpop.f32.mrb[1].mxu1 }
 0x13a   :  { %v630_v61 = vadd.f32 %v537_v60, %v457_v59  ;;  %v459_v62 = vpop.f32.mrb[2].mxu0  ;;  %v539_v63 = vpop.f32.mrb[2].mxu1 }
 0x13b   :  { %v615_v2 = vadd.f32 %v539_v63, %v459_v62  ;;  %v461_v3 = vpop.f32.mrb[3].mxu0  ;;  %v541_v16 = vpop.f32.mrb[3].mxu1 }
 0x13c   :  { %v646_v17 = vmul.f32 %v630_v61, %v614_v58  ;;  %v631_v4 = vadd.f32 %v541_v16, %v461_v3 }
 0x13e   :  { %v647_v5 = vmul.f32 %v631_v4, %v615_v2 }
 0x140   :  { %v662_v6 = vadd.f32 %v647_v5, %v646_v17  ;;  %v465_v1 = vpop.f32.mrb[4].mxu0  ;;  %v545_v7 = vpop.f32.mrb[4].mxu1 }
 0x141   :  { %v616_v8 = vadd.f32 %v545_v7, %v465_v1  ;;  %v467_v9 = vpop.f32.mrb[5].mxu0  ;;  %v547_v10 = vpop.f32.mrb[5].mxu1 }
 0x142   :  { %v632_v14 = vadd.f32 %v547_v10, %v467_v9  ;;  %v469_v26 = vpop.f32.mrb[6].mxu0  ;;  %v549_v27 = vpop.f32.mrb[6].mxu1 }
 0x143   :  { %v617_v28 = vadd.f32 %v549_v27, %v469_v26  ;;  %v471_v29 = vpop.f32.mrb[7].mxu0  ;;  %v551_v30 = vpop.f32.mrb[7].mxu1 }
 0x144   :  { %v648_v31 = vmul.f32 %v632_v14, %v616_v8  ;;  %v633_v18 = vadd.f32 %v551_v30, %v471_v29 }
 0x146   :  { %v663_v22 = vadd.f32 %v662_v6, %v648_v31  ;;  %v649_v32 = vmul.f32 %v633_v18, %v617_v28 }
 0x148   :  { %v664_v33 = vadd.f32 %v663_v22, %v649_v32  ;;  %v475_v34 = vpop.f32.mrb[8].mxu0  ;;  %v555_v35 = vpop.f32.mrb[8].mxu1 }
 0x149   :  { %v618_v19 = vadd.f32 %v555_v35, %v475_v34  ;;  %v477_v36 = vpop.f32.mrb[9].mxu0  ;;  %v557_v37 = vpop.f32.mrb[9].mxu1 }
 0x14a   :  { %v634_v11 = vadd.f32 %v557_v37, %v477_v36  ;;  %v479_v20 = vpop.f32.mrb[10].mxu0  ;;  %v559_v12 = vpop.f32.mrb[10].mxu1 }
 0x14b   :  { %v619_v38 = vadd.f32 %v559_v12, %v479_v20  ;;  %v481_v39 = vpop.f32.mrb[11].mxu0  ;;  %v561_v40 = vpop.f32.mrb[11].mxu1 }
 0x14c   :  { %v650_v41 = vmul.f32 %v634_v11, %v618_v19  ;;  %v635_v42 = vadd.f32 %v561_v40, %v481_v39 }
 0x14e   :  { %v665_v23 = vadd.f32 %v664_v33, %v650_v41  ;;  %v651_v43 = vmul.f32 %v635_v42, %v619_v38 }
 0x150   :  { %v666_v44 = vadd.f32 %v665_v23, %v651_v43  ;;  %v485_v21 = vpop.f32.mrb[12].mxu0  ;;  %v565_v24 = vpop.f32.mrb[12].mxu1 }
 0x151   :  { %v620_v25 = vadd.f32 %v565_v24, %v485_v21  ;;  %v487_v45 = vpop.f32.mrb[13].mxu0  ;;  %v567_v46 = vpop.f32.mrb[13].mxu1 }
 0x152   :  { %v636_v47 = vadd.f32 %v567_v46, %v487_v45  ;;  %v489_v48 = vpop.f32.mrb[14].mxu0  ;;  %v569_v49 = vpop.f32.mrb[14].mxu1 }
 0x153   :  { %v621_v50 = vadd.f32 %v569_v49, %v489_v48  ;;  %v491_v51 = vpop.f32.mrb[15].mxu0  ;;  %v571_v13 = vpop.f32.mrb[15].mxu1 }
 0x154   :  { %v652_v15 = vmul.f32 %v636_v47, %v620_v25  ;;  %v637_v52 = vadd.f32 %v571_v13, %v491_v51 }
 0x156   :  { %v667_v53 = vadd.f32 %v666_v44, %v652_v15  ;;  %v653_v54 = vmul.f32 %v637_v52, %v621_v50 }
 0x158   :  { %v668_v55 = vadd.f32 %v667_v53, %v653_v54  ;;  %v495_v56 = vpop.f32.mrb[16].mxu0  ;;  %v575_v57 = vpop.f32.mrb[16].mxu1 }
 0x159   :  { %v622_v58 = vadd.f32 %v575_v57, %v495_v56  ;;  %v497_v59 = vpop.f32.mrb[17].mxu0  ;;  %v577_v60 = vpop.f32.mrb[17].mxu1 }
 0x15a   :  { %v638_v61 = vadd.f32 %v577_v60, %v497_v59  ;;  %v499_v62 = vpop.f32.mrb[18].mxu0  ;;  %v579_v63 = vpop.f32.mrb[18].mxu1 }
 0x15b   :  { %v623_v2 = vadd.f32 %v579_v63, %v499_v62  ;;  %v501_v3 = vpop.f32.mrb[19].mxu0  ;;  %v581_v16 = vpop.f32.mrb[19].mxu1  ;;  %v687_v62 = vand.u32 127, %v72_v0 }
 0x15c   :  { %v654_v17 = vmul.f32 %v638_v61, %v622_v58  ;;  %v639_v4 = vadd.f32 %v581_v16, %v501_v3 }
 0x15d   :  { %vm690_vm0 = vcmp.lt.s32.totalorder %v687_v62, 36 }
 0x15e   :  { %v669_v5 = vadd.f32 %v668_v55, %v654_v17  ;;  %v655_v6 = vmul.f32 %v639_v4, %v623_v2 }
 0x160   :  { %v670_v1 = vadd.f32 %v669_v5, %v655_v6  ;;  %v505_v7 = vpop.f32.mrb[20].mxu0  ;;  %v585_v8 = vpop.f32.mrb[20].mxu1 }
 0x161   :  { %v624_v9 = vadd.f32 %v585_v8, %v505_v7  ;;  %v507_v10 = vpop.f32.mrb[21].mxu0  ;;  %v587_v14 = vpop.f32.mrb[21].mxu1 }
 0x162   :  { %v640_v26 = vadd.f32 %v587_v14, %v507_v10  ;;  %v509_v27 = vpop.f32.mrb[22].mxu0  ;;  %v589_v28 = vpop.f32.mrb[22].mxu1 }
 0x163   :  { %v625_v29 = vadd.f32 %v589_v28, %v509_v27  ;;  %v511_v30 = vpop.f32.mrb[23].mxu0  ;;  %v591_v31 = vpop.f32.mrb[23].mxu1 }
 0x164   :  { %v656_v18 = vmul.f32 %v640_v26, %v624_v9  ;;  %v641_v22 = vadd.f32 %v591_v31, %v511_v30 }
 0x166   :  { %v671_v32 = vadd.f32 %v670_v1, %v656_v18  ;;  %v657_v33 = vmul.f32 %v641_v22, %v625_v29 }
 0x168   :  { %v672_v34 = vadd.f32 %v671_v32, %v657_v33  ;;  %v515_v35 = vpop.f32.mrb[24].mxu0  ;;  %v595_v19 = vpop.f32.mrb[24].mxu1 }
 0x169   :  { %v626_v36 = vadd.f32 %v595_v19, %v515_v35  ;;  %v517_v37 = vpop.f32.mrb[25].mxu0  ;;  %v597_v11 = vpop.f32.mrb[25].mxu1 }
 0x16a   :  { %v642_v20 = vadd.f32 %v597_v11, %v517_v37  ;;  %v519_v12 = vpop.f32.mrb[26].mxu0  ;;  %v599_v38 = vpop.f32.mrb[26].mxu1 }
 0x16b   :  { %v627_v39 = vadd.f32 %v599_v38, %v519_v12  ;;  %v521_v40 = vpop.f32.mrb[27].mxu0  ;;  %v601_v41 = vpop.f32.mrb[27].mxu1 }
 0x16c   :  { %v658_v42 = vmul.f32 %v642_v20, %v626_v36  ;;  %v643_v23 = vadd.f32 %v601_v41, %v521_v40 }
 0x16e   :  { %v673_v43 = vadd.f32 %v672_v34, %v658_v42  ;;  %v659_v44 = vmul.f32 %v643_v23, %v627_v39 }
 0x170   :  { %v674_v21 = vadd.f32 %v673_v43, %v659_v44  ;;  %v525_v24 = vpop.f32.mrb[28].mxu0  ;;  %v605_v25 = vpop.f32.mrb[28].mxu1 }
 0x171   :  { %v628_v45 = vadd.f32 %v605_v25, %v525_v24  ;;  %v527_v46 = vpop.f32.mrb[29].mxu0  ;;  %v607_v47 = vpop.f32.mrb[29].mxu1 }
 0x172   :  { %v644_v48 = vadd.f32 %v607_v47, %v527_v46  ;;  %v529_v49 = vpop.f32.mrb[30].mxu0  ;;  %v609_v50 = vpop.f32.mrb[30].mxu1 }
 0x173   :  { %v629_v51 = vadd.f32 %v609_v50, %v529_v49  ;;  %v531_v13 = vpop.f32.mrb[31].mxu0  ;;  %v611_v15 = vpop.f32.mrb[31].mxu1 }
 0x174   :  { %v660_v52 = vmul.f32 %v644_v48, %v628_v45  ;;  %v645_v53 = vadd.f32 %v611_v15, %v531_v13 }
 0x176   :  { %v675_v54 = vadd.f32 %v674_v21, %v660_v52  ;;  %v661_v55 = vmul.f32 %v645_v53, %v629_v51 }
 0x178   :  { %v676_v56 = vadd.f32 %v675_v54, %v661_v55 }
 0x17a   :  { %v677_v57 = vrot.slane %v676_v56, 4 }
 0x17c   :  { %v678_v58 = vadd.f32 %v677_v57, %v676_v56 }
 0x17e   :  { %v679_v59 = vrot.slane %v678_v58, 2 }
 0x180   :  { %v680_v60 = vadd.f32 %v679_v59, %v678_v58 }
 0x182   :  { %v681_v61 = vrot.slane %v680_v60, 1 }
 0x184   :  { %v682_v63 = vadd.f32 %v681_v61, %v680_v60 }
 0x186   :  { %v683_v2 = vadd.f32 1.0, %v682_v63 }
 0x188   :  { %v684_v3 = vmax.f32 %v683_v2, 0.0 }
 0x18a   :  { %v691_v16 = vsel %vm690_vm0, %v684_v3, 0.0 }
 0x18b   :  { %v693_v17 = vsel %vm692_vm1, %v691_v16, 0.0 }
 0x18c   :  { %694 = vadd.xlane.f32.xlu0 %v693_v17 }
 0x219   :  { %v695_v4 = vpop.xlane.xlu0 %694 }
 0x21a   :  { %v696_v5 = vrot.slane %v695_v4, 4 }
 0x21c   :  { %v697_v6 = vadd.f32 %v696_v5, %v695_v4 }
 0x21e   :  { %v698_v1 = vrot.slane %v697_v6, 2 }
 0x220   :  { %v699_v7 = vadd.f32 %v698_v1, %v697_v6 }
 0x222   :  { %v700_v8 = vrot.slane %v699_v7, 1 }
 0x224   :  { %v701_v9 = vadd.f32 %v700_v8, %v699_v7 }
 0x226   :  { %833 = vpush %v701_v9 }
 0x257   :  { %s834_s7 = spop %833 }
 0x258   :  { %v703_v0 = vstv %s834_s7 }
 0x259   :  { %704 = vst [vmem:[#allocation7] sm:$0xff] %v703_v0 }
 0x25a   :  { %913 = shalt.err (!%p910_p6)
}
 0x25b   :  { %s914_s11 = scalar_lea.hbm %s1177_s2, 128 }
 0x25c   :  { %p915_p7 = scmp.ne.s32.totalorder %s1177_s2, %s914_s11  ;;  %p918_p8 = scmp.lt.u32.totalorder %s914_s11, %s1177_s2 }
 0x25e   :  { %p920_p9 = pnand %p918_p8, %p915_p7 }
 0x260   :  { %923 = shalt.err (!%p920_p9)
}
 0x261   :  { %714 = dma.vmem_to_hbm [thread:$0]  %s712_s6, 128, %s1177_s2, [#allocation4]  }
 0x262   :  { %928 = dma.done.wait [#allocation4], 128  }
 0x263   :  { %929 = vsyncadd [#allocation4], 4294967168 }
 0x264   :  { %718 = vsyncpa [#allocation3], 1 }
 0x265   :  { %719 = vsyncpa [#allocation6], 1 }
 0x266   :  { %720 = vsyncpa [#allocation4], 1 }

</bundles_post_ra>
